<compile_context>
chip_gen: v5e
topology: v5e:2x2
jax: 0.10.0
libtpu: 0.0.40
codegen_flags: <defaults>
</compile_context>

<pallas_src>
import jax
import jax.numpy as jnp
from jax.experimental import pallas as pl
from jax.experimental.pallas import tpu as pltpu


# ---------------------------------------------------------------------------
# Fused kernel: 1x1 conv (all heads) + per-head channel softmax + bilinear
# resize.  One grid step handles one image on whole-array blocks.
# ---------------------------------------------------------------------------
def fused_heads_kernel(x_ref, w_ref, g_ref, q_ref, border_ref, o_ref):
    # x_ref: (C, S)        w_ref: (HK, C)     g_ref: (HK, HK) block-diag mask
    # q_ref: (S, OH*OW)    border_ref: (1, OH*OW)    o_ref: (HK, OH*OW)

    # 1x1 conv for ALL sub-heads at once (spatial on the lane axis).
    logits = jnp.dot(w_ref[...], x_ref[...],
                     preferred_element_type=jnp.float32)            # (HK, S)

    # Softmax2d per head.  The global per-pixel max is constant within each
    # head's normalization group, so the softmax result is identical and
    # numerically stable (all exponents <= 0).
    m = jnp.max(logits, axis=0, keepdims=True)                      # (1, S)
    e = jnp.exp(logits - m)                                         # (HK, S)
    # Per-head denominators, already broadcast to (HK, S), via one tiny
    # block-diagonal matmul on the MXU (avoids a 3-D reshape/relayout).
    denom = jnp.dot(g_ref[...], e, preferred_element_type=jnp.float32)
    p = e * pl.reciprocal(denom, approx=True)                       # (HK, S)

    # Bilinear resize (align_corners=False) of the padding=1 conv output:
    # interior contribution via the precomputed kron operator, plus the
    # constant contribution of the uniform-1/K padding ring.
    r = jnp.dot(p, q_ref[...], preferred_element_type=jnp.float32)  # (HK, OHW)
    o_ref[...] = (r + border_ref[...]).astype(o_ref.dtype)


# ---------------------------------------------------------------------------
# Bilinear interpolation matrix matching PyTorch align_corners=False.
# ---------------------------------------------------------------------------
def _bilinear_matrix(out_size, in_size, dtype=jnp.float32):
    scale = in_size / out_size
    dst = jnp.arange(out_size, dtype=jnp.float32)
    src = (dst + 0.5) * scale - 0.5
    src = jnp.maximum(src, 0.0)                  # PyTorch clamps negatives to 0
    i0 = jnp.floor(src).astype(jnp.int32)
    i0 = jnp.minimum(i0, in_size - 1)
    i1 = jnp.minimum(i0 + 1, in_size - 1)
    w1 = src - i0.astype(jnp.float32)
    w0 = 1.0 - w1
    rows = jnp.arange(out_size)
    A = jnp.zeros((out_size, in_size), dtype)
    A = A.at[rows, i0].add(w0.astype(dtype))
    A = A.at[rows, i1].add(w1.astype(dtype))
    return A


# ---------------------------------------------------------------------------
# Wrapper: SegmentationNet10aHead.forward
# ---------------------------------------------------------------------------
def segmentation_head_forward(x, weights, input_sz):
    """x: (N, C, H, W) float32 NCHW. weights: list of (K, C, 1, 1) conv weights."""
    N, C, H, W = x.shape
    num_heads = len(weights)
    K = weights[0].shape[0]
    HK = num_heads * K
    Hp, Wp = H + 2, W + 2              # spatial size after 1x1 conv w/ padding=1
    OH = OW = int(input_sz)
    S = H * W
    OHW = OH * OW

    x_r = x.reshape(N, C, S)                                         # free reshape
    # Stack all sub-head 1x1 conv weights: (HK, C); head h owns rows [h*K,(h+1)*K).
    w_all = jnp.concatenate([w[:, :, 0, 0] for w in weights], axis=0)

    # Block-diagonal "same head" mask for the per-head softmax denominators.
    head_id = jnp.repeat(jnp.arange(num_heads), K)
    G = (head_id[:, None] == head_id[None, :]).astype(jnp.float32)   # (HK, HK)

    # Bilinear (align_corners=False) operators for (Hp, Wp) -> (OH, OW).
    A = _bilinear_matrix(OH, Hp)                   # (OH, Hp)
    B = _bilinear_matrix(OW, Wp)                   # (OW, Wp)
    A_in = A[:, 1:Hp - 1]                          # (OH, H) interior rows
    Bt_in = B[:, 1:Wp - 1].T                       # (W, OW) interior cols

    # Constant border contribution: the padding ring is exactly 1/K post-softmax.
    ring = jnp.ones((Hp, Wp), jnp.float32).at[1:Hp - 1, 1:Wp - 1].set(0.0)
    border = (A @ ring @ B.T) / float(K)           # (OH, OW)
    border_flat = border.reshape(1, OHW)

    # Separable resize folded into one operator: out = P(HK, S) @ Q + border.
    Q = jnp.kron(A_in.T, Bt_in)                    # (S, OHW)

    out = pl.pallas_call(
        fused_heads_kernel,
        out_shape=jax.ShapeDtypeStruct((N, HK, OHW), jnp.float32),
        grid=(N,),
        in_specs=[
            # x[n]: one DMA per image
            pl.BlockSpec((None, C, S), lambda n: (n, 0, 0)),
            # stacked 1x1 conv weights, head mask, resize operator, border:
            # constant block index -> fetched once, VMEM-resident for all n.
            pl.BlockSpec((HK, C), lambda n: (0, 0)),
            pl.BlockSpec((HK, HK), lambda n: (0, 0)),
            pl.BlockSpec((S, OHW), lambda n: (0, 0)),
            pl.BlockSpec((1, OHW), lambda n: (0, 0)),
        ],
        out_specs=pl.BlockSpec((None, HK, OHW), lambda n: (n, 0, 0)),
        compiler_params=pltpu.CompilerParams(
            dimension_semantics=("parallel",)),
    )(x_r, w_all, G, Q, border_flat)

    out = out.reshape(N, num_heads, K, OH, OW)
    return [out[:, h] for h in range(num_heads)]


# ---------------------------------------------------------------------------
# Pure-JAX reference (same math as the PyTorch module) for a sanity check.
# ---------------------------------------------------------------------------
def _reference_forward(x, weights, input_sz):
    N, C, H, W = x.shape
    Hp, Wp = H + 2, W + 2
    OH = OW = int(input_sz)
    A = _bilinear_matrix(OH, Hp)
    B = _bilinear_matrix(OW, Wp)
    xp = jnp.pad(x, ((0, 0), (0, 0), (1, 1), (1, 1)))
    outs = []
    for w in weights:
        logits = jnp.einsum('kc,nchw->nkhw', w[:, :, 0, 0], xp)
        p = jax.nn.softmax(logits, axis=1)
        outs.append(jnp.einsum('oh,nkhw,pw->nkop', A, p, B))
    return outs


if __name__ == "__main__":
    # Small shapes consistent with the module (num_features = cfg[-1][0]).
    N, C, H, W = 2, 8, 16, 16
    output_k = 6
    num_sub_heads = 2
    input_sz = 16

    key = jax.random.PRNGKey(0)
    kx, *kws = jax.random.split(key, 1 + num_sub_heads)
    x = jax.random.normal(kx, (N, C, H, W), dtype=jnp.float32)

    # PyTorch Conv2d default init: U(-1/sqrt(fan_in), 1/sqrt(fan_in))
    bound = 1.0 / (C ** 0.5)
    weights = [
        jax.random.uniform(k, (output_k, C, 1, 1), jnp.float32, -bound, bound)
        for k in kws
    ]

    outs = jax.block_until_ready(segmentation_head_forward(x, weights, input_sz))
    refs = jax.block_until_ready(_reference_forward(x, weights, input_sz))

    assert len(outs) == num_sub_heads
    for o, r in zip(outs, refs):
        assert o.shape == (N, output_k, input_sz, input_sz)
        assert bool(jnp.all(jnp.isfinite(o)))
        max_err = float(jnp.max(jnp.abs(o - r)))
        assert max_err < 3e-3, f"max abs err {max_err}"

    print("KERNEL_OK")
</pallas_src>

<mosaic_0001>
module attributes {stable_mosaic.version = 11 : i64} {
  func.func @fused_heads_kernel(%arg0: i32, %arg1: memref<1x8x256xf32, #tpu.memory_space<vmem>>, %arg2: memref<12x8xf32, #tpu.memory_space<vmem>>, %arg3: memref<12x12xf32, #tpu.memory_space<vmem>>, %arg4: memref<256x256xf32, #tpu.memory_space<vmem>>, %arg5: memref<1x256xf32, #tpu.memory_space<vmem>>, %arg6: memref<1x12x256xf32, #tpu.memory_space<vmem>>) attributes {dimension_semantics = [#tpu.dimension_semantics<parallel>], iteration_bounds = array<i64: 2>, scalar_prefetch = 0 : i64, scratch_operands = 0 : i64, tpu.core_type = #tpu.core_type<tc>, window_params = [{transform_indices = @transform_0, window_bounds = array<i64: 1, 8, 256>}, {pipeline_mode = #tpu.pipeline_mode<synchronous>, transform_indices = @transform_1, window_bounds = array<i64: 12, 8>}, {pipeline_mode = #tpu.pipeline_mode<synchronous>, transform_indices = @transform_2, window_bounds = array<i64: 12, 12>}, {pipeline_mode = #tpu.pipeline_mode<synchronous>, transform_indices = @transform_3, window_bounds = array<i64: 256, 256>}, {pipeline_mode = #tpu.pipeline_mode<synchronous>, transform_indices = @transform_4, window_bounds = array<i64: 1, 256>}, {transform_indices = @transform_5, window_bounds = array<i64: 1, 12, 256>}]} {
    %c0 = arith.constant 0 : index
    %c0_0 = arith.constant 0 : index
    %0 = vector.load %arg2[%c0, %c0_0] : memref<12x8xf32, #tpu.memory_space<vmem>>, vector<12x8xf32>
    %c0_1 = arith.constant 0 : index
    %c0_2 = arith.constant 0 : index
    %c0_3 = arith.constant 0 : index
    %1 = vector.load %arg1[%c0_1, %c0_2, %c0_3] : memref<1x8x256xf32, #tpu.memory_space<vmem>>, vector<1x8x256xf32>
    %2 = vector.shape_cast %1 : vector<1x8x256xf32> to vector<8x256xf32>
    %cst = arith.constant dense<0.000000e+00> : vector<12x256xf32>
    %3 = tpu.matmul %0, %2, %cst {dimension_numbers = #tpu.dot_dimension_numbers<[1], [0], [0], [1], [0, 0, 1, 1], [], []>} : vector<12x8xf32>, vector<8x256xf32>, vector<12x256xf32> -> vector<12x256xf32>
    %cst_4 = arith.constant dense<0xFF800000> : vector<256xf32>
    %4 = vector.multi_reduction <maximumf>, %3, %cst_4 [0] : vector<12x256xf32> to vector<256xf32>
    %5 = vector.shape_cast %4 : vector<256xf32> to vector<1x256xf32>
    %6 = vector.broadcast %5 : vector<1x256xf32> to vector<12x256xf32>
    %7 = arith.subf %3, %6 : vector<12x256xf32>
    %8 = math.exp %7 : vector<12x256xf32>
    %c0_5 = arith.constant 0 : index
    %c0_6 = arith.constant 0 : index
    %9 = vector.load %arg3[%c0_5, %c0_6] : memref<12x12xf32, #tpu.memory_space<vmem>>, vector<12x12xf32>
    %cst_7 = arith.constant dense<0.000000e+00> : vector<12x256xf32>
    %10 = tpu.matmul %9, %8, %cst_7 {dimension_numbers = #tpu.dot_dimension_numbers<[1], [0], [0], [1], [0, 0, 1, 1], [], []>} : vector<12x12xf32>, vector<12x256xf32>, vector<12x256xf32> -> vector<12x256xf32>
    %11 = tpu.reciprocal %10 {approx = true} : vector<12x256xf32> -> vector<12x256xf32>
    %12 = arith.mulf %8, %11 : vector<12x256xf32>
    %c0_8 = arith.constant 0 : index
    %c0_9 = arith.constant 0 : index
    %13 = vector.load %arg4[%c0_8, %c0_9] : memref<256x256xf32, #tpu.memory_space<vmem>>, vector<256x256xf32>
    %cst_10 = arith.constant dense<0.000000e+00> : vector<12x256xf32>
    %14 = tpu.matmul %12, %13, %cst_10 {dimension_numbers = #tpu.dot_dimension_numbers<[1], [0], [0], [1], [0, 0, 1, 1], [], []>} : vector<12x256xf32>, vector<256x256xf32>, vector<12x256xf32> -> vector<12x256xf32>
    %c0_11 = arith.constant 0 : index
    %c0_12 = arith.constant 0 : index
    %15 = vector.load %arg5[%c0_11, %c0_12] : memref<1x256xf32, #tpu.memory_space<vmem>>, vector<1x256xf32>
    %16 = vector.broadcast %15 : vector<1x256xf32> to vector<12x256xf32>
    %17 = arith.addf %14, %16 : vector<12x256xf32>
    %c0_13 = arith.constant 0 : index
    %c0_14 = arith.constant 0 : index
    %c0_15 = arith.constant 0 : index
    %18 = vector.load %arg6[%c0_13, %c0_14, %c0_15] : memref<1x12x256xf32, #tpu.memory_space<vmem>>, vector<1x12x256xf32>
    %19 = vector.shape_cast %18 : vector<1x12x256xf32> to vector<12x256xf32>
    %20 = vector.shape_cast %17 : vector<12x256xf32> to vector<1x12x256xf32>
    tpu.vector_store %arg6[%c0_13, %c0_14, %c0_15], %20 {strides = array<i32>} : memref<1x12x256xf32, #tpu.memory_space<vmem>>, vector<1x12x256xf32>,
    return
  }
  func.func @transform_0(%arg0: i32) -> (i32, i32, i32) {
    %c0_i32 = arith.constant 0 : i32
    %c0_i32_0 = arith.constant 0 : i32
    %c0_i32_1 = arith.constant 0 : i32
    return %arg0, %c0_i32, %c0_i32_0 : i32, i32, i32
  }
  func.func @transform_1(%arg0: i32) -> (i32, i32) {
    %c0_i32 = arith.constant 0 : i32
    %c0_i32_0 = arith.constant 0 : i32
    %c0_i32_1 = arith.constant 0 : i32
    return %c0_i32, %c0_i32_0 : i32, i32
  }
  func.func @transform_2(%arg0: i32) -> (i32, i32) {
    %c0_i32 = arith.constant 0 : i32
    %c0_i32_0 = arith.constant 0 : i32
    %c0_i32_1 = arith.constant 0 : i32
    return %c0_i32, %c0_i32_0 : i32, i32
  }
  func.func @transform_3(%arg0: i32) -> (i32, i32) {
    %c0_i32 = arith.constant 0 : i32
    %c0_i32_0 = arith.constant 0 : i32
    %c0_i32_1 = arith.constant 0 : i32
    return %c0_i32, %c0_i32_0 : i32, i32
  }
  func.func @transform_4(%arg0: i32) -> (i32, i32) {
    %c0_i32 = arith.constant 0 : i32
    %c0_i32_0 = arith.constant 0 : i32
    %c0_i32_1 = arith.constant 0 : i32
    return %c0_i32, %c0_i32_0 : i32, i32
  }
  func.func @transform_5(%arg0: i32) -> (i32, i32, i32) {
    %c0_i32 = arith.constant 0 : i32
    %c0_i32_0 = arith.constant 0 : i32
    %c0_i32_1 = arith.constant 0 : i32
    return %arg0, %c0_i32, %c0_i32_0 : i32, i32, i32
  }
}

</mosaic_0001>

<bundles_post_ra>
// kernel: tpu_custom_call.1
= control target key start
LH: loop header
LB: loop body
LE: loop exit
PB: predicated region body
PF: predicated region fallthrough
CT: control target
= control target key end

     0   :  { %10 = vsyncpa [#allocation3], 0  ;;  %s1029_s0 = inlined_call_operand.hbm [shape: f32[2,8,256], index: 0, kind: input, shape index: {}]   ;;  %s1030_s1 = inlined_call_operand.vmem [shape: f32[12,8], index: 1, kind: input, shape index: {}]   ;;  %s1031_s2 = inlined_call_operand.vmem [shape: f32[12,12], index: 2, kind: input, shape index: {}]   ;;  %s1032_s3 = inlined_call_operand.hbm [shape: f32[256,256], index: 3, kind: input, shape index: {}]   ;;  %s1033_s4 = inlined_call_operand.vmem [shape: f32[1,256], index: 4, kind: input, shape index: {}]   ;;  %s1034_s5 = inlined_call_operand.vmem [shape: f32[2,12,256], index: 5, kind: output, shape index: {}]  }
   0x1   :  { %12 = vsyncpa [#allocation3 + $0x1], 0 }
   0x2   :  { %13 = vsyncpa [#allocation5], 0  ;;  %s887_s18 = smov 0   ;;  %s889_s19 = smov 0  }
   0x3   :  { %s891_s20 = smov 0   ;;  %s893_s21 = smov 0  }
   0x4 LB: > { %s177_s24 = sshll.u32 %s1032_s3, 4  ;;  %s909_s25 = sadd.s32 4294967295, %s852_s21   ;;  %s852_s21 = sphi %s893_s21, %s1041_s21   ;;  %s848_s20 = sphi %s891_s20, %s1040_s20   ;;  %s844_s19 = sphi %s889_s19, %s1039_s19   ;;  %s840_s18 = sphi %s887_s18, %s1038_s18   ;;  %s178_s24 = int_to_ptr.hbm [resolvable:$true] %s177_s24 }
   0x5   : > { %p661_p0 = scmp.ge.s32.totalorder %s852_s21, 1  ;;  %p40_p1 = scmp.eq.s32.totalorder %s909_s25, 0 }
   0x6   : > { %p160_p2 = scmp.lt.s32.totalorder %s852_s21, 3  ;;  %s854_s27 = smov [#allocation4]  }
   0x7   : > { %s179_s28 = sshll.u32 %s854_s27, 4  ;;  %s855_s29 = smov 256   ;;  %s180_s28 = int_to_ptr.vmem [resolvable:$true] %s179_s28 }
   0x8   : > { %p914_p3 = pnand %p661_p0, %p160_p2  ;;  %s856_s30 = smov 16  }
   0x9   : > { %s923_s6 = sadd.s32 1, %s852_s21   ;;  %s26_s8 = sadd.s32 1, %s848_s20 }
   0xa   : > { %p692_p4 = pneg %p914_p3  ;;  %s23_s7 = ssub.s32 %s852_s21, %s923_s6 }
   0xb   : > { %p24_p6 = scmp.eq.s32.totalorder %s23_s7, 0  ;;  %p33_p7 = scmp.ne.s32.totalorder %s848_s20, %s844_s19 }
   0xc   : > { %p693_p5 = pnand %p692_p4, %p40_p1  ;;  %p34_p8 = scmp.eq.s32.totalorder %s852_s21, 0 }
   0xd   : > { %p39_p9 = scmp.ne.s32.totalorder %s844_s19, %s840_s18  ;;  %p701_p12 = scmp.lt.s32.totalorder %s852_s21, 2 }
   0xe   : > { %695 = dma.hbm_to_vmem [thread:$0]  (!%p693_p5), %s178_s24, 8192, %s180_s28, [#allocation5], %s855_s29, %s855_s29, %s856_s30  }
   0xf   : > { %s933_s9 = scalar_select %p24_p6, %s848_s20, %s26_s8  }
  0x10   : > { %p35_p10 = por %p34_p8, %p33_p7  ;;  %p937_p11 = por %p40_p1, %p39_p9 }
  0x11   : > { %s196_s11 = sand.u32 1, %s848_s20   ;;  %s684_s13 = sshll.u32 %s852_s21, 4 }
  0x12   : > { %s664_s12 = sshll.u32 %s196_s11, 4  ;;  %s205_s16 = scalar_lea.hbm %s1029_s0, %s684_s13 }
  0x13   : > { %s200_s17 = scalar_lea.vmem [#allocation2], %s664_s12  ;;  %s207_s23 = sshll.u32 %s205_s16, 4  ;;  %s208_s23 = int_to_ptr.hbm [resolvable:$true] %s207_s23 }
  0x14   : > { %s209_s22 = sshll.u32 %s200_s17, 4  ;;  %p947_p13 = pnand %p701_p12, %p35_p10  ;;  %s210_s22 = int_to_ptr.vmem [resolvable:$true] %s209_s22 }
  0x15   : > { %s197_s24 = scalar_lea.sflag [#allocation3], %s196_s11  ;;  %s784_s27 = sshra.s32 %s208_s23, 4  ;;  %s785_s27 = int_to_ptr.hbm [resolvable:$true] %s784_s27 }
  0x16   : > { %s786_s28 = scalar_lea.hbm %s785_s27, 16  ;;  %p788_p2 = pneg %p947_p13 }
  0x17   : > { %p787_p0 = scmp.ne.s32.totalorder %s785_s27, %s786_s28  ;;  %s791_s30 = scalar_lea.hbm %s1029_s0, 32 }
  0x18   : > { %p792_p6 = scmp.lt.s32.totalorder %s785_s27, %s1029_s0  ;;  %p793_p7 = scmp.lt.s32.totalorder %s791_s30, %s786_s28 }
  0x19   : > { %p789_p4 = pnand %p788_p2, %p787_p0 }
  0x1a   : > { %p794_p8 = por %p793_p7, %p792_p6 }
  0x1b   : > { %p790_p5 = pneg %p789_p4 }
  0x1d   : > { %p795_p9 = pnand %p794_p8, %p790_p5 }
  0x1f   : > { %798 = shalt.err (!%p795_p9)
}
  0x20   : > { %699 = dma.hbm_to_vmem [thread:$0]  (!%p947_p13), %s208_s23, 256, %s210_s22, %s197_s24  }
  0x21   : > { %218 = sbr.rel (%p914_p3) target bundleno = 492 (0x1ec), region = 40  ;;  %s220_s11 = sand.u32 (!%p914_p3), 1, %s844_s19  }
  0x22   : > { %s668_s12 = sshll.u32 (!%p914_p3), %s220_s11, 4  ;;  %s221_s13 = scalar_lea.sflag (!%p914_p3), [#allocation3], %s220_s11 }
  0x23   : > { %s224_s14 = scalar_lea.vmem (!%p914_p3), [#allocation2], %s668_s12 }
  0x26   : > { %831 = dma.done.wait (%p937_p11), %s221_s13, 256  }
  0x27   : > { %833 = vsyncadd (%p937_p11), %s221_s13, 4294967040 }
  0x28   : > { %835 = dma.done.wait (%p40_p1), [#allocation5], 8192  }
  0x29   : > { %837 = vsyncadd (%p40_p1), [#allocation5], 4294959104  ;;  %vm266_vm0 = vcmask 64512   ;;  %v264_v0 = vld [vmem:[%s224_s14] sm:$0xff]  ;;  %v265_v1 = vld [vmem:[%s224_s14 + $0x8] sm:$0xff]  ;;  %vm319_vm1 = vcmask 1043456  }
  0x2a   : > { %v262_v2 = vld [vmem:[%s1030_s1] sm:$0xff]  ;;  %288 = vmatpush.msra.mxu0 %v264_v0  ;;  %311 = vmatpush.msra.mxu1 %v265_v1  ;;  %v263_v3 = vld [vmem:[%s1030_s1 + $0x8] sm:$0xf]  ;;  %v447_v16 = vld [vmem:[#allocation4 + $0xf0] sm:$0xff]  ;;  %vm350_vm2 = vcmask 97280   ;;  %p257_p1 = scmp.lt.s32.totalorder %s909_s25, 1 }
  0x2b   : > { %672 = vmatmul.msk.f32.vlgmr.msra.gmra.mxu0 %vm266_vm0, %v262_v2  ;;  %674 = vmatmul.msk.f32.vlgmr.msra.gmra.mxu1 %vm266_vm0, %v262_v2  ;;  %v479_v17 = vld [vmem:[#allocation4 + $0x1f0] sm:$0xff]  ;;  %v445_v20 = vld [vmem:[#allocation4 + $0xe0] sm:$0xff]  ;;  %v448_v58 = vld [vmem:[#allocation4 + $0xf8] sm:$0xff] }
  0x2c   : > { %487 = vmatpush.msrb.mxu0 %v447_v16  ;;  %510 = vmatpush.msrb.mxu1 %v479_v17  ;;  %v477_v21 = vld [vmem:[#allocation4 + $0x1e0] sm:$0xff]  ;;  %v443_v22 = vld [vmem:[#allocation4 + $0xd0] sm:$0xff]  ;;  %v480_v60 = vld [vmem:[#allocation4 + $0x1f8] sm:$0xff]  ;;  %s1043_s25 = smov (!%p257_p1, %s909_s25), 1 }
  0x2d   : > { %v475_v25 = vld [vmem:[#allocation4 + $0x1d0] sm:$0xff]  ;;  %v441_v26 = vld [vmem:[#allocation4 + $0xc0] sm:$0xff]  ;;  %v446_v61 = vld [vmem:[#allocation4 + $0xe8] sm:$0xff]  ;;  %s685_s28 = sshll.u32 %s1043_s25, 5 }
  0x2e   : > { %488 = vmatpush.msrb.mxu0 %v445_v20  ;;  %511 = vmatpush.msrb.mxu1 %v477_v21  ;;  %v473_v27 = vld [vmem:[#allocation4 + $0x1c0] sm:$0xff]  ;;  %v439_v30 = vld [vmem:[#allocation4 + $0xb0] sm:$0xff]  ;;  %v478_v62 = vld [vmem:[#allocation4 + $0x1e8] sm:$0xff]  ;;  %s261_s30 = scalar_lea.vmem %s1034_s5, %s685_s28 }
  0x2f   : > { %v471_v33 = vld [vmem:[#allocation4 + $0x1b0] sm:$0xff]  ;;  %v437_v34 = vld [vmem:[#allocation4 + $0xa0] sm:$0xff]  ;;  %v444_v63 = vld [vmem:[#allocation4 + $0xd8] sm:$0xff] }
  0x30   : > { %489 = vmatpush.msrb.mxu0 %v443_v22  ;;  %512 = vmatpush.msrb.mxu1 %v475_v25  ;;  %v469_v39 = vld [vmem:[#allocation4 + $0x1a0] sm:$0xff]  ;;  %v435_v40 = vld [vmem:[#allocation4 + $0x90] sm:$0xff]  ;;  %v476_v0 = vld [vmem:[#allocation4 + $0x1d8] sm:$0xff] }
  0x31   : > { %v467_v43 = vld [vmem:[#allocation4 + $0x190] sm:$0xff]  ;;  %v433_v46 = vld [vmem:[#allocation4 + $0x80] sm:$0xff]  ;;  %v442_v1 = vld [vmem:[#allocation4 + $0xc8] sm:$0xff] }
  0x32   : > { %490 = vmatpush.msrb.mxu0 %v441_v26  ;;  %513 = vmatpush.msrb.mxu1 %v473_v27  ;;  %v465_v47 = vld [vmem:[#allocation4 + $0x180] sm:$0xff]  ;;  %v431_v48 = vld [vmem:[#allocation4 + $0x70] sm:$0xff]  ;;  %v349_v2 = vld [vmem:[%s1031_s2 + $0x8] sm:$0xf] }
  0x33   : > { %673 = vmatmul.msk.f32.gmra.mxu0 %vm266_vm0, %v263_v3  ;;  %675 = vmatmul.msk.f32.gmra.mxu1 %vm266_vm0, %v263_v3  ;;  %v463_v49 = vld [vmem:[#allocation4 + $0x170] sm:$0xff]  ;;  %v429_v50 = vld [vmem:[#allocation4 + $0x60] sm:$0xff]  ;;  %v474_v3 = vld [vmem:[#allocation4 + $0x1c8] sm:$0xff] }
  0x34   : > { %491 = vmatpush.msrb.mxu0 %v439_v30  ;;  %514 = vmatpush.msrb.mxu1 %v471_v33  ;;  %v461_v51 = vld [vmem:[#allocation4 + $0x160] sm:$0xff]  ;;  %v427_v52 = vld [vmem:[#allocation4 + $0x50] sm:$0xff]  ;;  %v428_v16 = vld [vmem:[#allocation4 + $0x58] sm:$0xff] }
  0x35   : > { %v459_v54 = vld [vmem:[#allocation4 + $0x150] sm:$0xff]  ;;  %v348_v56 = vld [vmem:[%s1031_s2] sm:$0xff]  ;;  %v460_v17 = vld [vmem:[#allocation4 + $0x158] sm:$0xff] }
  0x36   : > { %492 = vmatpush.msrb.mxu0 %v437_v34  ;;  %515 = vmatpush.msrb.mxu1 %v469_v39  ;;  %v426_v20 = vld [vmem:[#allocation4 + $0x48] sm:$0xff]  ;;  %v423_v22 = vld [vmem:[#allocation4 + $0x30] sm:$0xff]  ;;  %v456_v25 = vld [vmem:[#allocation4 + $0x138] sm:$0xff] }
  0x37   : > { %v458_v21 = vld [vmem:[#allocation4 + $0x148] sm:$0xff]  ;;  %v421_v26 = vld [vmem:[#allocation4 + $0x20] sm:$0xff]  ;;  %v419_v30 = vld [vmem:[#allocation4 + $0x10] sm:$0xff] }
  0x38   : > { %493 = vmatpush.msrb.mxu0 %v435_v40  ;;  %516 = vmatpush.msrb.mxu1 %v467_v43  ;;  %v453_v27 = vld [vmem:[#allocation4 + $0x120] sm:$0xff]  ;;  %v452_v33 = vld [vmem:[#allocation4 + $0x118] sm:$0xff] }
  0x39   : > { %v417_v34 = vld [vmem:[#allocation4] sm:$0xff] }
  0x3a   : > { %494 = vmatpush.msrb.mxu0 %v433_v46  ;;  %517 = vmatpush.msrb.mxu1 %v465_v47 }
  0x3c   : > { %495 = vmatpush.msrb.mxu0 %v431_v48  ;;  %518 = vmatpush.msrb.mxu1 %v463_v49 }
  0x3e   : > { %496 = vmatpush.msrb.mxu0 %v429_v50  ;;  %519 = vmatpush.msrb.mxu1 %v461_v51  ;;  %v481_v50 = vld [vmem:[%s1033_s4] sm:$0x3] }
  0x3f   : > { %v483_v51 = vperm.slane %v481_v50, 0 }
  0x40   : > { %497 = vmatpush.msrb.mxu0 %v427_v52  ;;  %520 = vmatpush.msrb.mxu1 %v459_v54 }
  0xa8   : > { %v290_v4 = vpop.f32.mrf.mxu0  ;;  %v313_v5 = vpop.f32.mrf.mxu1 }
  0xb0   : > { %v293_v6 = vpop.f32.mrf.mxu0  ;;  %v316_v7 = vpop.f32.mrf.mxu1 }
  0xb1   : > { %v320_v8 = vsel %vm319_vm1, %v293_v6, -inf  ;;  %v328_v9 = vsel %vm319_vm1, %v316_v7, -inf }
  0xb2   : > { %v321_v10 = vmax.f32 %v290_v4, %v320_v8  ;;  %v329_v11 = vmax.f32 %v313_v5, %v328_v9  ;;  %v436_v8 = vld [vmem:[#allocation4 + $0x98] sm:$0xff] }
  0xb3   : > { %v468_v9 = vld [vmem:[#allocation4 + $0x198] sm:$0xff] }
  0xb4   : > { %v322_v12 = vrot.slane %v321_v10, 4  ;;  %v330_v13 = vrot.slane %v329_v11, 4 }
  0xb6   : > { %v323_v14 = vmax.f32 %v321_v10, %v322_v12  ;;  %v331_v15 = vmax.f32 %v329_v11, %v330_v13  ;;  %v434_v10 = vld [vmem:[#allocation4 + $0x88] sm:$0xff]  ;;  %v432_v12 = vld [vmem:[#allocation4 + $0x78] sm:$0xff] }
  0xb7   : > { %v466_v11 = vld [vmem:[#allocation4 + $0x188] sm:$0xff]  ;;  %v464_v13 = vld [vmem:[#allocation4 + $0x178] sm:$0xff] }
  0xb8   : > { %v324_v18 = vrot.slane %v323_v14, 2  ;;  %v332_v19 = vrot.slane %v331_v15, 2 }
  0xba   : > { %v325_v23 = vmax.f32 %v323_v14, %v324_v18  ;;  %v333_v24 = vmax.f32 %v331_v15, %v332_v19  ;;  %v430_v14 = vld [vmem:[#allocation4 + $0x68] sm:$0xff]  ;;  %v425_v18 = vld [vmem:[#allocation4 + $0x40] sm:$0xff] }
  0xbb   : > { %v462_v15 = vld [vmem:[#allocation4 + $0x168] sm:$0xff]  ;;  %v457_v19 = vld [vmem:[#allocation4 + $0x140] sm:$0xff]  ;;  %498 = vmatpush.msrb.mxu0 %v425_v18 }
  0xbc   : > { %v326_v28 = vrot.slane %v325_v23, 1  ;;  %v334_v29 = vrot.slane %v333_v24, 1  ;;  %521 = vmatpush.msrb.mxu1 %v457_v19 }
  0xbd   : > { %499 = vmatpush.msrb.mxu0 %v423_v22 }
  0xbe   : > { %v327_v31 = vmax.f32 %v325_v23, %v326_v28  ;;  %v335_v32 = vmax.f32 %v333_v24, %v334_v29  ;;  %v455_v23 = vld [vmem:[#allocation4 + $0x130] sm:$0xff]  ;;  %v424_v24 = vld [vmem:[#allocation4 + $0x38] sm:$0xff]  ;;  %v422_v28 = vld [vmem:[#allocation4 + $0x28] sm:$0xff] }
  0xbf   : > { %522 = vmatpush.msrb.mxu1 %v455_v23  ;;  %v454_v29 = vld [vmem:[#allocation4 + $0x128] sm:$0xff]  ;;  %500 = vmatpush.msrb.mxu0 %v421_v26 }
  0xc0   : > { %v336_v35 = vsub.f32 %v290_v4, %v327_v31  ;;  %v338_v36 = vsub.f32 %v293_v6, %v327_v31  ;;  %v337_v37 = vsub.f32 %v313_v5, %v335_v32  ;;  %v339_v38 = vsub.f32 %v316_v7, %v335_v32  ;;  %v440_v4 = vld [vmem:[#allocation4 + $0xb8] sm:$0xff]  ;;  %v438_v6 = vld [vmem:[#allocation4 + $0xa8] sm:$0xff]  ;;  %v451_v31 = vld [vmem:[#allocation4 + $0x110] sm:$0xff] }
  0xc1   : > { %v472_v5 = vld [vmem:[#allocation4 + $0x1b8] sm:$0xff]  ;;  %v470_v7 = vld [vmem:[#allocation4 + $0x1a8] sm:$0xff]  ;;  %523 = vmatpush.msrb.mxu1 %v453_v27  ;;  %501 = vmatpush.msrb.mxu0 %v419_v30 }
  0xc2   : > { %v340_v41 = vmul.f32 1.442695, %v336_v35  ;;  %v344_v42 = vmul.f32 1.442695, %v338_v36  ;;  %v342_v44 = vmul.f32 1.442695, %v337_v37 }
  0xc3   : > { %v346_v45 = vmul.f32 1.442695, %v339_v38  ;;  %v420_v32 = vld [vmem:[#allocation4 + $0x18] sm:$0xff]  ;;  %524 = vmatpush.msrb.mxu1 %v451_v31  ;;  %v449_v35 = vld [vmem:[#allocation4 + $0x100] sm:$0xff]  ;;  %v418_v36 = vld [vmem:[#allocation4 + $0x8] sm:$0xff]  ;;  %502 = vmatpush.msrb.mxu0 %v417_v34 }
  0xc4   : > { %738 = vpow2.f32 %v344_v42  ;;  %v450_v37 = vld [vmem:[#allocation4 + $0x108] sm:$0xff] }
  0xc5   : > { %740 = vpow2.f32 %v346_v45  ;;  %525 = vmatpush.msrb.mxu1 %v449_v35 }
  0xc6   : > { %742 = vpow2.f32 %v340_v41 }
  0xc7   : > { %744 = vpow2.f32 %v342_v44 }
  0xca   : > { %v980_v53 = vpop.eup %738 }
  0xcb   : > { %v982_v55 = vpop.eup %740  ;;  %676 = vmatpush.msk.msra.mxu2 %vm319_vm1, %v980_v53 }
  0xcc   : > { %v989_v57 = vpop.eup %742  ;;  %679 = vmatpush.msk.msra.mxu3 %vm319_vm1, %v982_v55 }
  0xcd   : > { %v993_v59 = vpop.eup %744  ;;  %378 = vmatpush.msra.mxu2 %v989_v57 }
  0xce   : > { %401 = vmatpush.msra.mxu3 %v993_v59  ;;  %677 = vmatmul.msk.f32.vlgmr.msra.gmra.mxu2 %vm350_vm2, %v348_v56 }
  0xcf   : > { %680 = vmatmul.msk.f32.vlgmr.msra.gmra.mxu3 %vm350_vm2, %v348_v56  ;;  %533 = vmatpush.msrb.mxu2 %v448_v58 }
  0xd0   : > { %556 = vmatpush.msrb.mxu3 %v480_v60 }
  0xd1   : > { %534 = vmatpush.msrb.mxu2 %v446_v61 }
  0xd2   : > { %557 = vmatpush.msrb.mxu3 %v478_v62 }
  0xd3   : > { %535 = vmatpush.msrb.mxu2 %v444_v63 }
  0xd4   : > { %558 = vmatpush.msrb.mxu3 %v476_v0 }
  0xd5   : > { %536 = vmatpush.msrb.mxu2 %v442_v1 }
  0xd6   : > { %678 = vmatmul.msk.f32.gmra.mxu2 %vm350_vm2, %v349_v2  ;;  %559 = vmatpush.msrb.mxu3 %v474_v3 }
  0xd7   : > { %681 = vmatmul.msk.f32.gmra.mxu3 %vm350_vm2, %v349_v2  ;;  %537 = vmatpush.msrb.mxu2 %v440_v4 }
  0xd8   : > { %560 = vmatpush.msrb.mxu3 %v472_v5 }
  0xd9   : > { %538 = vmatpush.msrb.mxu2 %v438_v6 }
  0xda   : > { %561 = vmatpush.msrb.mxu3 %v470_v7 }
  0xdb   : > { %539 = vmatpush.msrb.mxu2 %v436_v8 }
  0xdc   : > { %562 = vmatpush.msrb.mxu3 %v468_v9 }
  0xdd   : > { %540 = vmatpush.msrb.mxu2 %v434_v10 }
  0xde   : > { %563 = vmatpush.msrb.mxu3 %v466_v11 }
  0xdf   : > { %541 = vmatpush.msrb.mxu2 %v432_v12 }
  0xe0   : > { %564 = vmatpush.msrb.mxu3 %v464_v13 }
  0xe1   : > { %542 = vmatpush.msrb.mxu2 %v430_v14 }
  0xe2   : > { %565 = vmatpush.msrb.mxu3 %v462_v15 }
  0xe3   : > { %543 = vmatpush.msrb.mxu2 %v428_v16 }
  0xe4   : > { %566 = vmatpush.msrb.mxu3 %v460_v17 }
  0xe5   : > { %544 = vmatpush.msrb.mxu2 %v426_v20 }
  0xe6   : > { %567 = vmatpush.msrb.mxu3 %v458_v21 }
  0xe7   : > { %545 = vmatpush.msrb.mxu2 %v424_v24 }
  0xe8   : > { %568 = vmatpush.msrb.mxu3 %v456_v25 }
  0xe9   : > { %546 = vmatpush.msrb.mxu2 %v422_v28 }
  0xea   : > { %569 = vmatpush.msrb.mxu3 %v454_v29 }
  0xeb   : > { %547 = vmatpush.msrb.mxu2 %v420_v32 }
  0xec   : > { %570 = vmatpush.msrb.mxu3 %v452_v33 }
  0xed   : > { %548 = vmatpush.msrb.mxu2 %v418_v36 }
  0xee   : > { %571 = vmatpush.msrb.mxu3 %v450_v37 }
 0x151   : > { %v380_v38 = vpop.f32.mrf.mxu2 }
 0x152   : > { %746 = vrcp.f32 %v380_v38  ;;  %v403_v39 = vpop.f32.mrf.mxu3 }
 0x153   : > { %748 = vrcp.f32 %v403_v39 }
 0x158   : > { %v747_v40 = vpop.eup %746 }
 0x159   : > { %v749_v41 = vpop.eup %748  ;;  %v383_v42 = vpop.f32.mrf.mxu2  ;;  %v413_v43 = vmul.f32 %v747_v40, %v989_v57 }
 0x15a   : > { %750 = vrcp.f32 %v383_v42  ;;  %v406_v44 = vpop.f32.mrf.mxu3  ;;  %v414_v45 = vmul.f32 %v749_v41, %v993_v59 }
 0x15b   : > { %752 = vrcp.f32 %v406_v44  ;;  %503 = vmatmul.f32.vlgmr.msrb.gmra.mxu0 %v413_v43  ;;  %549 = vmatmul.f32.vlgmr.msrb.gmra.mxu2 %v413_v43 }
 0x15c   : > { %526 = vmatmul.f32.vlgmr.msrb.gmra.mxu1 %v414_v45  ;;  %572 = vmatmul.f32.vlgmr.msrb.gmra.mxu3 %v414_v45 }
 0x160   : > { %v751_v46 = vpop.eup %750 }
 0x161   : > { %v753_v47 = vpop.eup %752  ;;  %v415_v48 = vmul.f32 %v751_v46, %v980_v53 }
 0x162   : > { %v416_v49 = vmul.f32 %v753_v47, %v982_v55  ;;  %v484_v55 = vperm.slane %v481_v50, 1 }
 0x163   : > { %506 = vmatmul.f32.gmra.mxu0 %v415_v48  ;;  %552 = vmatmul.f32.gmra.mxu2 %v415_v48 }
 0x164   : > { %529 = vmatmul.f32.gmra.mxu1 %v416_v49  ;;  %575 = vmatmul.f32.gmra.mxu3 %v416_v49 }
 0x1d8   : > { %v504_v52 = vpop.f32.mrf.mxu0 }
 0x1d9   : > { %v505_v54 = vadd.f32 %v504_v52, %v483_v51  ;;  %v527_v56 = vpop.f32.mrf.mxu1 }
 0x1db   : > { %v528_v53 = vadd.f32 %v527_v56, %v505_v54 }
 0x1dd   : > { %579 = vst [vmem:[%s261_s30] sm:$0xff] %v528_v53 }
 0x1de   : > { %v550_v57 = vpop.f32.mrf.mxu2 }
 0x1df   : > { %v551_v58 = vadd.f32 %v550_v57, %v484_v55  ;;  %v573_v59 = vpop.f32.mrf.mxu3 }
 0x1e0   : > { %v507_v60 = vpop.f32.mrf.mxu0 }
 0x1e1   : > { %v574_v61 = vadd.f32 %v573_v59, %v551_v58  ;;  %v508_v62 = vadd.f32 %v507_v60, %v483_v51  ;;  %v530_v63 = vpop.f32.mrf.mxu1 }
 0x1e3   : > { %580 = vst [vmem:[%s261_s30 + $0x8] sm:$0xff] %v574_v61  ;;  %v531_v0 = vadd.f32 %v530_v63, %v508_v62 }
 0x1e5   : > { %581 = vst [vmem:[%s261_s30 + $0x10] sm:$0xf] %v531_v0 }
 0x1e6   : > { %v553_v1 = vpop.f32.mrf.mxu2 }
 0x1e7   : > { %v554_v2 = vadd.f32 %v553_v1, %v484_v55  ;;  %v576_v3 = vpop.f32.mrf.mxu3 }
 0x1e9   : > { %v577_v4 = vadd.f32 %v576_v3, %v554_v2 }
 0x1eb   : > { %582 = vst [vmem:[%s261_s30 + $0x18] sm:$0xf] %v577_v4 }
 0x1ec PF: > { %p16_p3 = scmp.ge.s32.totalorder %s923_s6, 4   ;;  %s1038_s18 = smov %s844_s19 }
 0x1ed   : > { %s1039_s19 = smov %s848_s20  ;;  %s1040_s20 = smov %s933_s9 }
 0x1ee   : > { %s1041_s21 = smov %s923_s6  ;;  %18 = sbr.rel (!%p16_p3) target bundleno = 4 (0x4), region = 84 }
 0x1f3   :  { %604 = vsyncpa [#allocation3], 1 }
 0x1f4   :  { %606 = vsyncpa [#allocation3 + $0x1], 1 }
 0x1f5   :  { %607 = vsyncpa [#allocation5], 1 }

</bundles_post_ra>
